<compile_context>
chip_gen: v7x
topology: tpu7x:2x2x1
jax: 0.10.0
libtpu: 0.0.40
codegen_flags: <defaults>
</compile_context>

<pallas_src>
import functools

import jax
import jax.numpy as jnp
from jax import lax
from jax.experimental import pallas as pl
from jax.experimental.pallas import tpu as pltpu


def _round_up(n, m):
    return (n + m - 1) // m * m


# ----------------------------------------------------------------------------
# Pallas kernel: full encoder forward (3 matmuls + folded BN/ReLU + L2 normalize)
# ----------------------------------------------------------------------------
def _encoder_kernel(x_ref, w1_ref, s1_ref, b1_ref,
                    w2_ref, s2_ref, b2_ref,
                    w3_ref, b3_ref, o_ref):
    # Linear(input_dim, 512) + folded eval-mode BatchNorm1d(512) + ReLU
    h1 = jnp.dot(x_ref[...], w1_ref[...], preferred_element_type=jnp.float32)
    h1 = h1 * s1_ref[...] + b1_ref[...]
    h1 = jnp.maximum(h1, 0.0).astype(jnp.bfloat16)

    # Linear(512, 256) + folded eval-mode BatchNorm1d(256) + ReLU
    h2 = jnp.dot(h1, w2_ref[...], preferred_element_type=jnp.float32)
    h2 = h2 * s2_ref[...] + b2_ref[...]
    h2 = jnp.maximum(h2, 0.0).astype(jnp.bfloat16)

    # Linear(256, embedding_dim)
    e = jnp.dot(h2, w3_ref[...], preferred_element_type=jnp.float32) + b3_ref[...]

    # F.normalize(e, p=2, dim=1): e / max(||e||_2, 1e-12), via one EUP rsqrt.
    sum_sq = jnp.sum(e * e, axis=1, keepdims=True)
    inv = lax.rsqrt(jnp.maximum(sum_sq, 1e-24))
    o_ref[...] = (e * inv).astype(o_ref.dtype)


_TB_MAX = 256  # max batch-tile rows per grid step (multiple of 16 for bf16)


def _encode(x, params):
    """Run the encoder (forward_once, possibly for a fused/concatenated batch)."""
    batch, in_dim = x.shape
    emb_dim = params["w3"].shape[1]

    in_pad = _round_up(in_dim, 128)    # lane-dense K for the first matmul
    emb_pad = _round_up(emb_dim, 128)  # lane-dense output stores

    # Batch tile: as large as possible up to _TB_MAX, padded batch divisible by it.
    b_pad = _round_up(batch, 16)
    if b_pad <= _TB_MAX:
        tb = b_pad
    else:
        tb = _TB_MAX
        b_pad = _round_up(batch, tb)

    # MXU-native bf16 inputs; zero-pad feature axes (padded K rows / N cols are
    # zero, so results and the L2 norm are unaffected).
    xb = jnp.pad(x.astype(jnp.bfloat16),
                 ((0, b_pad - batch), (0, in_pad - in_dim)))
    w1 = jnp.pad(params["w1"].astype(jnp.bfloat16),
                 ((0, in_pad - in_dim), (0, 0)))
    w2 = params["w2"].astype(jnp.bfloat16)
    w3 = jnp.pad(params["w3"].astype(jnp.bfloat16),
                 ((0, 0), (0, emb_pad - emb_dim)))
    b3 = jnp.pad(params["b3"], ((0, 0), (0, emb_pad - emb_dim)))

    h1_dim, h2_dim = w1.shape[1], w2.shape[1]

    # Weights / folded scale+bias stay VMEM-resident across the batch grid.
    def resident(shape):
        return pl.BlockSpec(shape, lambda i: (0, 0))

    out = pl.pallas_call(
        _encoder_kernel,
        out_shape=jax.ShapeDtypeStruct((b_pad, emb_pad), jnp.float32),
        grid=(b_pad // tb,),
        in_specs=[
            pl.BlockSpec((tb, in_pad), lambda i: (i, 0)),   # x (streamed)
            resident((in_pad, h1_dim)),                     # w1
            resident((1, h1_dim)), resident((1, h1_dim)),   # s1, b1
            resident((h1_dim, h2_dim)),                     # w2
            resident((1, h2_dim)), resident((1, h2_dim)),   # s2, b2
            resident((h2_dim, emb_pad)),                    # w3
            resident((1, emb_pad)),                         # b3
        ],
        out_specs=pl.BlockSpec((tb, emb_pad), lambda i: (i, 0)),
        compiler_params=pltpu.CompilerParams(
            dimension_semantics=("parallel",)),
    )(xb, w1, params["s1"], params["b1"],
      w2, params["s2"], params["b2"], w3, b3)

    return out[:batch, :emb_dim]


# ----------------------------------------------------------------------------
# Parameter construction (deterministic, mirrors nn.Module __init__ shapes)
# ----------------------------------------------------------------------------
def init_params(key, input_dim, embedding_dim=128):
    dims = [(input_dim, 512), (512, 256), (256, embedding_dim)]
    keys = jax.random.split(key, 6)
    params = {}
    eps = 1e-5

    # Linear 1 + BatchNorm1d(512), eval-mode folding
    w1 = jax.random.normal(keys[0], dims[0], jnp.float32) * 0.02
    lb1 = jax.random.normal(keys[1], (dims[0][1],), jnp.float32) * 0.02
    gamma1 = jnp.ones((dims[0][1],), jnp.float32)
    beta1 = jnp.zeros((dims[0][1],), jnp.float32)
    rmean1 = jnp.zeros((dims[0][1],), jnp.float32)
    rvar1 = jnp.ones((dims[0][1],), jnp.float32)
    scale1 = gamma1 / jnp.sqrt(rvar1 + eps)
    params["w1"] = w1
    params["s1"] = scale1.reshape(1, -1)
    params["b1"] = (scale1 * lb1 + beta1 - rmean1 * scale1).reshape(1, -1)

    # Linear 2 + BatchNorm1d(256), eval-mode folding
    w2 = jax.random.normal(keys[2], dims[1], jnp.float32) * 0.02
    lb2 = jax.random.normal(keys[3], (dims[1][1],), jnp.float32) * 0.02
    gamma2 = jnp.ones((dims[1][1],), jnp.float32)
    beta2 = jnp.zeros((dims[1][1],), jnp.float32)
    rmean2 = jnp.zeros((dims[1][1],), jnp.float32)
    rvar2 = jnp.ones((dims[1][1],), jnp.float32)
    scale2 = gamma2 / jnp.sqrt(rvar2 + eps)
    params["w2"] = w2
    params["s2"] = scale2.reshape(1, -1)
    params["b2"] = (scale2 * lb2 + beta2 - rmean2 * scale2).reshape(1, -1)

    # Linear 3 (embedding head)
    params["w3"] = jax.random.normal(keys[4], dims[2], jnp.float32) * 0.02
    params["b3"] = (jax.random.normal(keys[5], (dims[2][1],), jnp.float32) * 0.02
                    ).reshape(1, -1)
    return params


# ----------------------------------------------------------------------------
# Module-equivalent forward
# ----------------------------------------------------------------------------
@functools.partial(jax.jit, static_argnames=("mode",))
def siamese_forward(params, x1, x2=None, mode="siamese"):
    if mode == "siamese":
        # Fuse both branches into a single pallas_call: one weight DMA,
        # double the MXU rows, single launch.
        b = x1.shape[0]
        emb = _encode(jnp.concatenate([x1, x2], axis=0), params)
        return emb[:b], emb[b:]
    elif mode == "classify":
        # num_classes=None in this configuration -> no classifier head.
        # TODO(synk): classifier Linear(embedding_dim, num_classes) not instantiated.
        raise NotImplementedError("classifier head not configured (num_classes=None)")
    else:
        raise ValueError(mode)


if __name__ == "__main__":
    input_dim = 64
    embedding_dim = 128
    batch = 8

    key = jax.random.PRNGKey(0)
    kp, k1, k2 = jax.random.split(key, 3)
    params = init_params(kp, input_dim, embedding_dim)

    x1 = jax.random.normal(k1, (batch, input_dim), jnp.float32)
    x2 = jax.random.normal(k2, (batch, input_dim), jnp.float32)

    e1, e2 = siamese_forward(params, x1, x2, mode="siamese")
    jax.block_until_ready((e1, e2))

    assert e1.shape == (batch, embedding_dim)
    assert e2.shape == (batch, embedding_dim)
    # sanity: rows are unit-norm after F.normalize (normalization done in f32)
    assert jnp.allclose(jnp.linalg.norm(e1, axis=1), 1.0, atol=1e-4)
    assert jnp.allclose(jnp.linalg.norm(e2, axis=1), 1.0, atol=1e-4)

    print("KERNEL_OK")
</pallas_src>

<mosaic_0001>
module attributes {stable_mosaic.version = 11 : i64} {
  func.func @_encoder_kernel(%arg0: i32, %arg1: memref<16x128xbf16, #tpu.memory_space<vmem>>, %arg2: memref<128x512xbf16, #tpu.memory_space<vmem>>, %arg3: memref<1x512xf32, #tpu.memory_space<vmem>>, %arg4: memref<1x512xf32, #tpu.memory_space<vmem>>, %arg5: memref<512x256xbf16, #tpu.memory_space<vmem>>, %arg6: memref<1x256xf32, #tpu.memory_space<vmem>>, %arg7: memref<1x256xf32, #tpu.memory_space<vmem>>, %arg8: memref<256x128xbf16, #tpu.memory_space<vmem>>, %arg9: memref<1x128xf32, #tpu.memory_space<vmem>>, %arg10: memref<16x128xf32, #tpu.memory_space<vmem>>) attributes {dimension_semantics = [#tpu.dimension_semantics<parallel>], iteration_bounds = array<i64: 1>, scalar_prefetch = 0 : i64, scratch_operands = 0 : i64, tpu.core_type = #tpu.core_type<tc>, window_params = [{transform_indices = @transform_0, window_bounds = array<i64: 16, 128>}, {pipeline_mode = #tpu.pipeline_mode<synchronous>, transform_indices = @transform_1, window_bounds = array<i64: 128, 512>}, {pipeline_mode = #tpu.pipeline_mode<synchronous>, transform_indices = @transform_2, window_bounds = array<i64: 1, 512>}, {pipeline_mode = #tpu.pipeline_mode<synchronous>, transform_indices = @transform_3, window_bounds = array<i64: 1, 512>}, {pipeline_mode = #tpu.pipeline_mode<synchronous>, transform_indices = @transform_4, window_bounds = array<i64: 512, 256>}, {pipeline_mode = #tpu.pipeline_mode<synchronous>, transform_indices = @transform_5, window_bounds = array<i64: 1, 256>}, {pipeline_mode = #tpu.pipeline_mode<synchronous>, transform_indices = @transform_6, window_bounds = array<i64: 1, 256>}, {pipeline_mode = #tpu.pipeline_mode<synchronous>, transform_indices = @transform_7, window_bounds = array<i64: 256, 128>}, {pipeline_mode = #tpu.pipeline_mode<synchronous>, transform_indices = @transform_8, window_bounds = array<i64: 1, 128>}, {transform_indices = @transform_9, window_bounds = array<i64: 16, 128>}]} {
    %c0 = arith.constant 0 : index
    %c0_0 = arith.constant 0 : index
    %0 = vector.load %arg1[%c0, %c0_0] : memref<16x128xbf16, #tpu.memory_space<vmem>>, vector<16x128xbf16>
    %c0_1 = arith.constant 0 : index
    %c0_2 = arith.constant 0 : index
    %1 = vector.load %arg2[%c0_1, %c0_2] : memref<128x512xbf16, #tpu.memory_space<vmem>>, vector<128x512xbf16>
    %cst = arith.constant dense<0.000000e+00> : vector<16x512xf32>
    %2 = tpu.matmul %0, %1, %cst {dimension_numbers = #tpu.dot_dimension_numbers<[1], [0], [0], [1], [0, 0, 1, 1], [], []>} : vector<16x128xbf16>, vector<128x512xbf16>, vector<16x512xf32> -> vector<16x512xf32>
    %c0_3 = arith.constant 0 : index
    %c0_4 = arith.constant 0 : index
    %3 = vector.load %arg3[%c0_3, %c0_4] : memref<1x512xf32, #tpu.memory_space<vmem>>, vector<1x512xf32>
    %4 = vector.broadcast %3 : vector<1x512xf32> to vector<16x512xf32>
    %5 = arith.mulf %2, %4 : vector<16x512xf32>
    %c0_5 = arith.constant 0 : index
    %c0_6 = arith.constant 0 : index
    %6 = vector.load %arg4[%c0_5, %c0_6] : memref<1x512xf32, #tpu.memory_space<vmem>>, vector<1x512xf32>
    %7 = vector.broadcast %6 : vector<1x512xf32> to vector<16x512xf32>
    %8 = arith.addf %5, %7 : vector<16x512xf32>
    %cst_7 = arith.constant 0.000000e+00 : f32
    %9 = vector.broadcast %cst_7 : f32 to vector<16x512xf32>
    %10 = arith.maximumf %8, %9 : vector<16x512xf32>
    %11 = arith.truncf %10 : vector<16x512xf32> to vector<16x512xbf16>
    %c0_8 = arith.constant 0 : index
    %c0_9 = arith.constant 0 : index
    %12 = vector.load %arg5[%c0_8, %c0_9] : memref<512x256xbf16, #tpu.memory_space<vmem>>, vector<512x256xbf16>
    %cst_10 = arith.constant dense<0.000000e+00> : vector<16x256xf32>
    %13 = tpu.matmul %11, %12, %cst_10 {dimension_numbers = #tpu.dot_dimension_numbers<[1], [0], [0], [1], [0, 0, 1, 1], [], []>} : vector<16x512xbf16>, vector<512x256xbf16>, vector<16x256xf32> -> vector<16x256xf32>
    %c0_11 = arith.constant 0 : index
    %c0_12 = arith.constant 0 : index
    %14 = vector.load %arg6[%c0_11, %c0_12] : memref<1x256xf32, #tpu.memory_space<vmem>>, vector<1x256xf32>
    %15 = vector.broadcast %14 : vector<1x256xf32> to vector<16x256xf32>
    %16 = arith.mulf %13, %15 : vector<16x256xf32>
    %c0_13 = arith.constant 0 : index
    %c0_14 = arith.constant 0 : index
    %17 = vector.load %arg7[%c0_13, %c0_14] : memref<1x256xf32, #tpu.memory_space<vmem>>, vector<1x256xf32>
    %18 = vector.broadcast %17 : vector<1x256xf32> to vector<16x256xf32>
    %19 = arith.addf %16, %18 : vector<16x256xf32>
    %cst_15 = arith.constant 0.000000e+00 : f32
    %20 = vector.broadcast %cst_15 : f32 to vector<16x256xf32>
    %21 = arith.maximumf %19, %20 : vector<16x256xf32>
    %22 = arith.truncf %21 : vector<16x256xf32> to vector<16x256xbf16>
    %c0_16 = arith.constant 0 : index
    %c0_17 = arith.constant 0 : index
    %23 = vector.load %arg8[%c0_16, %c0_17] : memref<256x128xbf16, #tpu.memory_space<vmem>>, vector<256x128xbf16>
    %cst_18 = arith.constant dense<0.000000e+00> : vector<16x128xf32>
    %24 = tpu.matmul %22, %23, %cst_18 {dimension_numbers = #tpu.dot_dimension_numbers<[1], [0], [0], [1], [0, 0, 1, 1], [], []>} : vector<16x256xbf16>, vector<256x128xbf16>, vector<16x128xf32> -> vector<16x128xf32>
    %c0_19 = arith.constant 0 : index
    %c0_20 = arith.constant 0 : index
    %25 = vector.load %arg9[%c0_19, %c0_20] : memref<1x128xf32, #tpu.memory_space<vmem>>, vector<1x128xf32>
    %26 = vector.broadcast %25 : vector<1x128xf32> to vector<16x128xf32>
    %27 = arith.addf %24, %26 : vector<16x128xf32>
    %28 = arith.mulf %27, %27 : vector<16x128xf32>
    %cst_21 = arith.constant dense<0.000000e+00> : vector<16xf32>
    %29 = vector.multi_reduction <add>, %28, %cst_21 [1] : vector<16x128xf32> to vector<16xf32>
    %30 = vector.shape_cast %29 : vector<16xf32> to vector<16x1xf32>
    %cst_22 = arith.constant 1.000000e-24 : f32
    %31 = vector.broadcast %cst_22 : f32 to vector<16x1xf32>
    %32 = arith.maximumf %30, %31 : vector<16x1xf32>
    %33 = math.rsqrt %32 : vector<16x1xf32>
    %34 = vector.broadcast %33 : vector<16x1xf32> to vector<16x128xf32>
    %35 = arith.mulf %27, %34 : vector<16x128xf32>
    %c0_23 = arith.constant 0 : index
    %c0_24 = arith.constant 0 : index
    %36 = vector.load %arg10[%c0_23, %c0_24] : memref<16x128xf32, #tpu.memory_space<vmem>>, vector<16x128xf32>
    tpu.vector_store %arg10[%c0_23, %c0_24], %35 {strides = array<i32>} : memref<16x128xf32, #tpu.memory_space<vmem>>, vector<16x128xf32>,
    return
  }
  func.func @transform_0(%arg0: i32) -> (i32, i32) {
    %c0_i32 = arith.constant 0 : i32
    %c0_i32_0 = arith.constant 0 : i32
    return %arg0, %c0_i32 : i32, i32
  }
  func.func @transform_1(%arg0: i32) -> (i32, i32) {
    %c0_i32 = arith.constant 0 : i32
    %c0_i32_0 = arith.constant 0 : i32
    %c0_i32_1 = arith.constant 0 : i32
    return %c0_i32, %c0_i32_0 : i32, i32
  }
  func.func @transform_2(%arg0: i32) -> (i32, i32) {
    %c0_i32 = arith.constant 0 : i32
    %c0_i32_0 = arith.constant 0 : i32
    %c0_i32_1 = arith.constant 0 : i32
    return %c0_i32, %c0_i32_0 : i32, i32
  }
  func.func @transform_3(%arg0: i32) -> (i32, i32) {
    %c0_i32 = arith.constant 0 : i32
    %c0_i32_0 = arith.constant 0 : i32
    %c0_i32_1 = arith.constant 0 : i32
    return %c0_i32, %c0_i32_0 : i32, i32
  }
  func.func @transform_4(%arg0: i32) -> (i32, i32) {
    %c0_i32 = arith.constant 0 : i32
    %c0_i32_0 = arith.constant 0 : i32
    %c0_i32_1 = arith.constant 0 : i32
    return %c0_i32, %c0_i32_0 : i32, i32
  }
  func.func @transform_5(%arg0: i32) -> (i32, i32) {
    %c0_i32 = arith.constant 0 : i32
    %c0_i32_0 = arith.constant 0 : i32
    %c0_i32_1 = arith.constant 0 : i32
    return %c0_i32, %c0_i32_0 : i32, i32
  }
  func.func @transform_6(%arg0: i32) -> (i32, i32) {
    %c0_i32 = arith.constant 0 : i32
    %c0_i32_0 = arith.constant 0 : i32
    %c0_i32_1 = arith.constant 0 : i32
    return %c0_i32, %c0_i32_0 : i32, i32
  }
  func.func @transform_7(%arg0: i32) -> (i32, i32) {
    %c0_i32 = arith.constant 0 : i32
    %c0_i32_0 = arith.constant 0 : i32
    %c0_i32_1 = arith.constant 0 : i32
    return %c0_i32, %c0_i32_0 : i32, i32
  }
  func.func @transform_8(%arg0: i32) -> (i32, i32) {
    %c0_i32 = arith.constant 0 : i32
    %c0_i32_0 = arith.constant 0 : i32
    %c0_i32_1 = arith.constant 0 : i32
    return %c0_i32, %c0_i32_0 : i32, i32
  }
  func.func @transform_9(%arg0: i32) -> (i32, i32) {
    %c0_i32 = arith.constant 0 : i32
    %c0_i32_0 = arith.constant 0 : i32
    return %arg0, %c0_i32 : i32, i32
  }
}

</mosaic_0001>

<bundles_post_ra>
// kernel: siamese_forward.1
= control target key start
LH: loop header
LB: loop body
LE: loop exit
PB: predicated region body
PF: predicated region fallthrough
CT: control target
= control target key end

     0   :  { %v1399_v1 = vmov 0   ;;  %s1852_s1 = inlined_call_operand.vmem [shape: bf16[128,512], index: 1, kind: input, shape index: {}]   ;;  %s1853_s0 = inlined_call_operand.vmem [shape: bf16[16,128], index: 0, kind: input, shape index: {}]   ;;  %s1854_s4 = inlined_call_operand.vmem [shape: bf16[512,256], index: 4, kind: input, shape index: {}]   ;;  %s1855_s2 = inlined_call_operand.vmem [shape: f32[1,512], index: 2, kind: input, shape index: {}]   ;;  %s1856_s3 = inlined_call_operand.vmem [shape: f32[1,512], index: 3, kind: input, shape index: {}]   ;;  %s1857_s7 = inlined_call_operand.vmem [shape: bf16[256,128], index: 7, kind: input, shape index: {}]   ;;  %s1858_s5 = inlined_call_operand.vmem [shape: f32[1,256], index: 5, kind: input, shape index: {}]   ;;  %s1859_s6 = inlined_call_operand.vmem [shape: f32[1,256], index: 6, kind: input, shape index: {}]   ;;  %s1860_s8 = inlined_call_operand.vmem [shape: f32[1,128], index: 8, kind: input, shape index: {}]   ;;  %s1861_s9 = inlined_call_operand.vmem [shape: f32[16,128], index: 9, kind: output, shape index: {}]  }
   0x1   :  { %v1234_v0 = vld [vmem:[%s1852_s1 + $0x4] ss:$16 sps:$4 sm:$0xff]   ;;  %265 = vmatprep.mubr.bf16.mxu1 %v1399_v1  ;;  %v1236_v2 = vld [vmem:[%s1852_s1] ss:$16 sps:$4 sm:$0xff]   ;;  %v1261_v22 = vld [vmem:[%s1852_s1 + $0xc] ss:$16 sps:$4 sm:$0xff]  }
   0x2   :  { %233 = vmatprep.subr.bf16.mxu1 %v1234_v0  ;;  %v1237_v3 = vld [vmem:[%s1852_s1 + $0x24] ss:$16 sps:$4 sm:$0xff]   ;;  %v1239_v4 = vld [vmem:[%s1852_s1 + $0x20] ss:$16 sps:$4 sm:$0xff]   ;;  %v1259_v25 = vld [vmem:[%s1852_s1 + $0x8] ss:$16 sps:$4 sm:$0xff]  }
   0x3   :  { %234 = vmatpush1.bf16.msra.mxu1 %v1236_v2  ;;  %v1240_v5 = vld [vmem:[%s1852_s1 + $0x44] ss:$16 sps:$4 sm:$0xff]   ;;  %v1242_v6 = vld [vmem:[%s1852_s1 + $0x40] ss:$16 sps:$4 sm:$0xff]   ;;  %v1264_v26 = vld [vmem:[%s1852_s1 + $0x2c] ss:$16 sps:$4 sm:$0xff]  }
   0x4   :  { %235 = vmatprep.subr.bf16.mxu1 %v1237_v3  ;;  %v1243_v7 = vld [vmem:[%s1852_s1 + $0x64] ss:$16 sps:$4 sm:$0xff]   ;;  %v1245_v8 = vld [vmem:[%s1852_s1 + $0x60] ss:$16 sps:$4 sm:$0xff]   ;;  %v1262_v29 = vld [vmem:[%s1852_s1 + $0x28] ss:$16 sps:$4 sm:$0xff]   ;;  %v321_v3 = vlaneseq }
   0x5   :  { %v1246_v9 = vld [vmem:[%s1852_s1 + $0x84] ss:$16 sps:$4 sm:$0xff]   ;;  %v1248_v10 = vld [vmem:[%s1852_s1 + $0x80] ss:$16 sps:$4 sm:$0xff]   ;;  %v1267_v31 = vld [vmem:[%s1852_s1 + $0x4c] ss:$16 sps:$4 sm:$0xff]  }
   0x6   :  { %v1249_v11 = vld [vmem:[%s1852_s1 + $0xa4] ss:$16 sps:$4 sm:$0xff]   ;;  %v1251_v12 = vld [vmem:[%s1852_s1 + $0xa0] ss:$16 sps:$4 sm:$0xff]   ;;  %v1265_v32 = vld [vmem:[%s1852_s1 + $0x48] ss:$16 sps:$4 sm:$0xff]  }
   0x7   :  { %236 = vmatpush1.bf16.msra.mxu1 %v1239_v4  ;;  %v1252_v13 = vld [vmem:[%s1852_s1 + $0xc4] ss:$16 sps:$4 sm:$0xff]   ;;  %v1254_v14 = vld [vmem:[%s1852_s1 + $0xc0] ss:$16 sps:$4 sm:$0xff]   ;;  %v1270_v34 = vld [vmem:[%s1852_s1 + $0x6c] ss:$16 sps:$4 sm:$0xff]  }
   0x8   :  { %237 = vmatprep.subr.bf16.mxu1 %v1240_v5  ;;  %v1283_v15 = vld [vmem:[%s1854_s4 + $0x4] ss:$8 sps:$4 sm:$0xff]   ;;  %v1285_v16 = vld [vmem:[%s1854_s4] ss:$8 sps:$4 sm:$0xff]   ;;  %v1286_v18 = vld [vmem:[%s1854_s4 + $0x14] ss:$8 sps:$4 sm:$0xff]  }
   0x9   :  { %v1255_v17 = vld [vmem:[%s1852_s1 + $0xe4] ss:$16 sps:$4 sm:$0xff]   ;;  %775 = vmatprep.subr.bf16.mxu0 %v1283_v15  ;;  %v1288_v19 = vld [vmem:[%s1854_s4 + $0x10] ss:$8 sps:$4 sm:$0xff]   ;;  %v1291_v24 = vld [vmem:[%s1854_s4 + $0x20] ss:$8 sps:$4 sm:$0xff]  }
   0xa   :  { %776 = vmatpush1.bf16.msra.mxu0 %v1285_v16  ;;  %v1257_v20 = vld [vmem:[%s1852_s1 + $0xe0] ss:$16 sps:$4 sm:$0xff]   ;;  %v1289_v21 = vld [vmem:[%s1854_s4 + $0x24] ss:$8 sps:$4 sm:$0xff]   ;;  %v1292_v27 = vld [vmem:[%s1854_s4 + $0x34] ss:$8 sps:$4 sm:$0xff]  }
   0xb   :  { %238 = vmatpush1.bf16.msra.mxu1 %v1242_v6  ;;  %777 = vmatprep.subr.bf16.mxu0 %v1286_v18  ;;  %v1519_v23 = vld [vmem:[%s1853_s0] sm:$0xff]   ;;  %v1294_v28 = vld [vmem:[%s1854_s4 + $0x30] ss:$8 sps:$4 sm:$0xff]   ;;  %v1298_v35 = vld [vmem:[%s1854_s4 + $0x54] ss:$8 sps:$4 sm:$0xff]   ;;  %v1652_v4 = vshrl.u32 %v321_v3, 7 }
   0xc   :  { %239 = vmatprep.subr.bf16.mxu1 %v1243_v7  ;;  %v1295_v30 = vld [vmem:[%s1854_s4 + $0x44] ss:$8 sps:$4 sm:$0xff]   ;;  %v1297_v33 = vld [vmem:[%s1854_s4 + $0x40] ss:$8 sps:$4 sm:$0xff]   ;;  %v1300_v36 = vld [vmem:[%s1854_s4 + $0x50] ss:$8 sps:$4 sm:$0xff]  }
   0xd   :  { %v1268_v37 = vld [vmem:[%s1852_s1 + $0x68] ss:$16 sps:$4 sm:$0xff]   ;;  %v1301_v38 = vld [vmem:[%s1854_s4 + $0x64] ss:$8 sps:$4 sm:$0xff]   ;;  %v1304_v42 = vld [vmem:[%s1854_s4 + $0x74] ss:$8 sps:$4 sm:$0xff]  }
   0xe   :  { %778 = vmatpush1.bf16.msra.mxu0 %v1288_v19  ;;  %v1273_v39 = vld [vmem:[%s1852_s1 + $0x8c] ss:$16 sps:$4 sm:$0xff]   ;;  %v1303_v40 = vld [vmem:[%s1854_s4 + $0x60] ss:$8 sps:$4 sm:$0xff]   ;;  %v1306_v44 = vld [vmem:[%s1854_s4 + $0x70] ss:$8 sps:$4 sm:$0xff]  }
   0xf   :  { %240 = vmatpush1.bf16.msra.mxu1 %v1245_v8  ;;  %779 = vmatprep.subr.bf16.mxu0 %v1289_v21  ;;  %v1271_v41 = vld [vmem:[%s1852_s1 + $0x88] ss:$16 sps:$4 sm:$0xff]   ;;  %v1276_v43 = vld [vmem:[%s1852_s1 + $0xac] ss:$16 sps:$4 sm:$0xff]   ;;  %v331_v5 = vsub.s32 2, %v1652_v4  ;;  %v1384_v15 = vld [vmem:[%s1857_s7 + $0x10] sm:$0xff]  }
  0x10   :  { %241 = vmatprep.subr.bf16.mxu1 %v1246_v9  ;;  %v1274_v45 = vld [vmem:[%s1852_s1 + $0xa8] ss:$16 sps:$4 sm:$0xff]   ;;  %v1307_v46 = vld [vmem:[%s1854_s4 + $0x84] ss:$8 sps:$4 sm:$0xff]   ;;  %v1310_v50 = vld [vmem:[%s1854_s4 + $0x94] ss:$8 sps:$4 sm:$0xff]  }
  0x11   :  { %v1279_v47 = vld [vmem:[%s1852_s1 + $0xcc] ss:$16 sps:$4 sm:$0xff]   ;;  %v1309_v48 = vld [vmem:[%s1854_s4 + $0x80] ss:$8 sps:$4 sm:$0xff]   ;;  %v1312_v52 = vld [vmem:[%s1854_s4 + $0x90] ss:$8 sps:$4 sm:$0xff]  }
  0x12   :  { %780 = vmatpush1.bf16.msra.mxu0 %v1291_v24  ;;  %v1277_v49 = vld [vmem:[%s1852_s1 + $0xc8] ss:$16 sps:$4 sm:$0xff]   ;;  %v1282_v51 = vld [vmem:[%s1852_s1 + $0xec] ss:$16 sps:$4 sm:$0xff]   ;;  %v1658_v6 = vld [vmem:[%s1855_s2] sm:$0xf] }
  0x13   :  { %242 = vmatpush1.bf16.msra.mxu1 %v1248_v10  ;;  %781 = vmatprep.subr.bf16.mxu0 %v1292_v27  ;;  %v1280_v53 = vld [vmem:[%s1852_s1 + $0xe8] ss:$16 sps:$4 sm:$0xff]   ;;  %v1313_v54 = vld [vmem:[%s1854_s4 + $0xa4] ss:$8 sps:$4 sm:$0xff]   ;;  %v1316_v56 = vld [vmem:[%s1854_s4 + $0xb4] ss:$8 sps:$4 sm:$0xff]   ;;  %v1666_v8 = vrot.slane %v1658_v6, %v331_v5 }
  0x14   :  { %243 = vmatprep.subr.bf16.mxu1 %v1249_v11  ;;  %v1315_v55 = vld [vmem:[%s1854_s4 + $0xa0] ss:$8 sps:$4 sm:$0xff]   ;;  %v1318_v57 = vld [vmem:[%s1854_s4 + $0xb0] ss:$8 sps:$4 sm:$0xff]   ;;  %v1319_v58 = vld [vmem:[%s1854_s4 + $0xc4] ss:$8 sps:$4 sm:$0xff]  }
  0x15   :  { %v1321_v59 = vld [vmem:[%s1854_s4 + $0xc0] ss:$8 sps:$4 sm:$0xff]   ;;  %v1322_v60 = vld [vmem:[%s1854_s4 + $0xd4] ss:$8 sps:$4 sm:$0xff]   ;;  %v1324_v61 = vld [vmem:[%s1854_s4 + $0xd0] ss:$8 sps:$4 sm:$0xff]  }
  0x16   :  { %782 = vmatpush1.bf16.msra.mxu0 %v1294_v28  ;;  %v1325_v62 = vld [vmem:[%s1854_s4 + $0xe4] ss:$8 sps:$4 sm:$0xff]   ;;  %v1327_v63 = vld [vmem:[%s1854_s4 + $0xe0] ss:$8 sps:$4 sm:$0xff]   ;;  %v1328_v0 = vld [vmem:[%s1854_s4 + $0xf4] ss:$8 sps:$4 sm:$0xff]  }
  0x17   :  { %244 = vmatpush1.bf16.msra.mxu1 %v1251_v12  ;;  %783 = vmatprep.subr.bf16.mxu0 %v1295_v30  ;;  %v1333_v2 = vld [vmem:[%s1854_s4 + $0x104] ss:$8 sps:$4 sm:$0xff]   ;;  %v1663_v7 = vld [vmem:[%s1856_s3] sm:$0xf]  ;;  %v1385_v16 = vld [vmem:[%s1857_s7 + $0x58] sm:$0xff]   ;;  %v1705_v21 = vsub.s32 1, %v1652_v4 }
  0x18   :  { %245 = vmatprep.subr.bf16.mxu1 %v1252_v13  ;;  %v1669_v9 = vrot.slane %v1663_v7, %v331_v5  ;;  %v1379_v10 = vld [vmem:[%s1857_s7 + $0x40] sm:$0xff]   ;;  %v1381_v12 = vld [vmem:[%s1857_s7 + $0x48] sm:$0xff]  }
  0x19   :  { %v1380_v11 = vld [vmem:[%s1857_s7] sm:$0xff]   ;;  %v1382_v13 = vld [vmem:[%s1857_s7 + $0x8] sm:$0xff]  }
  0x1a   :  { %784 = vmatpush1.bf16.msra.mxu0 %v1297_v33  ;;  %v1387_v18 = vld [vmem:[%s1857_s7 + $0x60] sm:$0xff]  }
  0x1b   :  { %246 = vmatpush1.bf16.msra.mxu1 %v1254_v14  ;;  %785 = vmatprep.subr.bf16.mxu0 %v1298_v35  ;;  %v1383_v14 = vld [vmem:[%s1857_s7 + $0x50] sm:$0xff]   ;;  %v1388_v19 = vld [vmem:[%s1857_s7 + $0x20] sm:$0xff]  }
  0x1c   :  { %247 = vmatprep.subr.bf16.mxu1 %v1255_v17  ;;  %v1386_v17 = vld [vmem:[%s1857_s7 + $0x18] sm:$0xff]  }
  0x1e   :  { %786 = vmatpush1.bf16.msra.mxu0 %v1300_v36 }
  0x1f   :  { %248 = vmatpush1.bf16.msra.mxu1 %v1257_v20  ;;  %787 = vmatprep.subr.bf16.mxu0 %v1301_v38  ;;  %v1702_v20 = vsub.s32 0, %v1652_v4 }
  0x20   :  { %276 = vmatprep.subr.bf16.mxu1 %v1261_v22 }
  0x21   :  { %v324_v22 = vrot.slane %v1658_v6, %v1702_v20  ;;  %v354_v24 = vrot.slane %v1663_v7, %v1702_v20 }
  0x22   :  { %266 = vmatmul.mubr.bf16.vlgmr.msra.gmra.mrb[0].mxu1 %v1519_v23  ;;  %788 = vmatpush1.bf16.msra.mxu0 %v1303_v40 }
  0x23   :  { %277 = vmatpush1.bf16.msra.mxu1 %v1259_v25  ;;  %308 = vmatprep.mubr.bf16.mxu1 %v1399_v1  ;;  %v1330_v1 = vld [vmem:[%s1854_s4 + $0xf0] ss:$8 sps:$4 sm:$0xff]  }
  0x24   :  { %278 = vmatprep.subr.bf16.mxu1 %v1264_v26  ;;  %789 = vmatprep.subr.bf16.mxu0 %v1304_v42  ;;  %v358_v26 = vrot.slane %v1663_v7, %v1705_v21 }
  0x26   :  { %790 = vmatpush1.bf16.msra.mxu0 %v1306_v44  ;;  %v1331_v44 = vld [vmem:[%s1854_s4 + $0x100] ss:$8 sps:$4 sm:$0xff]  }
  0x27   :  { %279 = vmatpush1.bf16.msra.mxu1 %v1262_v29  ;;  %791 = vmatprep.subr.bf16.mxu0 %v1307_v46  ;;  %v1334_v46 = vld [vmem:[%s1854_s4 + $0x110] ss:$8 sps:$4 sm:$0xff]  }
  0x28   :  { %280 = vmatprep.subr.bf16.mxu1 %v1267_v31 }
  0x2a   :  { %792 = vmatpush1.bf16.msra.mxu0 %v1309_v48  ;;  %v1337_v48 = vld [vmem:[%s1854_s4 + $0x120] ss:$8 sps:$4 sm:$0xff]  }
  0x2b   :  { %281 = vmatpush1.bf16.msra.mxu1 %v1265_v32  ;;  %793 = vmatprep.subr.bf16.mxu0 %v1310_v50  ;;  %v1340_v50 = vld [vmem:[%s1854_s4 + $0x130] ss:$8 sps:$4 sm:$0xff]  }
  0x2c   :  { %282 = vmatprep.subr.bf16.mxu1 %v1270_v34 }
  0x2e   :  { %794 = vmatpush1.bf16.msra.mxu0 %v1312_v52  ;;  %v1343_v52 = vld [vmem:[%s1854_s4 + $0x140] ss:$8 sps:$4 sm:$0xff]  }
  0x2f   :  { %283 = vmatpush1.bf16.msra.mxu1 %v1268_v37  ;;  %795 = vmatprep.subr.bf16.mxu0 %v1313_v54  ;;  %v1348_v54 = vld [vmem:[%s1854_s4 + $0x154] ss:$8 sps:$4 sm:$0xff]  }
  0x30   :  { %284 = vmatprep.subr.bf16.mxu1 %v1273_v39 }
  0x32   :  { %796 = vmatpush1.bf16.msra.mxu0 %v1315_v55  ;;  %v1346_v55 = vld [vmem:[%s1854_s4 + $0x150] ss:$8 sps:$4 sm:$0xff]  }
  0x33   :  { %285 = vmatpush1.bf16.msra.mxu1 %v1271_v41  ;;  %797 = vmatprep.subr.bf16.mxu0 %v1316_v56 }
  0x34   :  { %286 = vmatprep.subr.bf16.mxu1 %v1276_v43 }
  0x36   :  { %798 = vmatpush1.bf16.msra.mxu0 %v1318_v57  ;;  %v1351_v57 = vld [vmem:[%s1854_s4 + $0x164] ss:$8 sps:$4 sm:$0xff]  }
  0x37   :  { %287 = vmatpush1.bf16.msra.mxu1 %v1274_v45  ;;  %799 = vmatprep.subr.bf16.mxu0 %v1319_v58  ;;  %v1336_v45 = vld [vmem:[%s1854_s4 + $0x114] ss:$8 sps:$4 sm:$0xff]  }
  0x38   :  { %288 = vmatprep.subr.bf16.mxu1 %v1279_v47  ;;  %v1339_v47 = vld [vmem:[%s1854_s4 + $0x124] ss:$8 sps:$4 sm:$0xff]  }
  0x3a   :  { %800 = vmatpush1.bf16.msra.mxu0 %v1321_v59 }
  0x3b   :  { %289 = vmatpush1.bf16.msra.mxu1 %v1277_v49  ;;  %801 = vmatprep.subr.bf16.mxu0 %v1322_v60  ;;  %v1342_v49 = vld [vmem:[%s1854_s4 + $0x134] ss:$8 sps:$4 sm:$0xff]  }
  0x3c   :  { %290 = vmatprep.subr.bf16.mxu1 %v1282_v51  ;;  %v1345_v51 = vld [vmem:[%s1854_s4 + $0x144] ss:$8 sps:$4 sm:$0xff]  }
  0x3e   :  { %802 = vmatpush1.bf16.msra.mxu0 %v1324_v61 }
  0x3f   :  { %291 = vmatpush1.bf16.msra.mxu1 %v1280_v53  ;;  %803 = vmatprep.subr.bf16.mxu0 %v1325_v62  ;;  %v335_v53 = vsub.s32 3, %v1652_v4  ;;  %v1349_v62 = vld [vmem:[%s1854_s4 + $0x160] ss:$8 sps:$4 sm:$0xff]  }
  0x40   :  { %1207 = vmatprep.subr.bf16.mxu1 %v1379_v10 }
  0x41   :  { %v336_v56 = vrot.slane %v1658_v6, %v335_v53  ;;  %v366_v59 = vrot.slane %v1663_v7, %v335_v53 }
  0x42   :  { %309 = vmatmul.mubr.bf16.vlgmr.msra.gmra.mrb[4].mxu1 %v1519_v23  ;;  %804 = vmatpush1.bf16.msra.mxu0 %v1327_v63  ;;  %v328_v23 = vrot.slane %v1658_v6, %v1705_v21 }
  0x43   :  { %805 = vmatprep.subr.bf16.mxu0 %v1328_v0  ;;  %1208 = vmatpush3.bf16.msra.mxu1 %v1380_v11  ;;  %v1352_v11 = vld [vmem:[%s1854_s4 + $0x170] ss:$8 sps:$4 sm:$0xff]  }
  0x44   :  { %1209 = vmatprep.subr.bf16.mxu1 %v1381_v12 }
  0x46   :  { %806 = vmatpush1.bf16.msra.mxu0 %v1330_v1  ;;  %v1354_v1 = vld [vmem:[%s1854_s4 + $0x174] ss:$8 sps:$4 sm:$0xff]  }
  0x47   :  { %818 = vmatprep.subr.bf16.mxu0 %v1333_v2  ;;  %1210 = vmatpush3.bf16.msra.mxu1 %v1382_v13 }
  0x48   :  { %1211 = vmatprep.subr.bf16.mxu1 %v1383_v14  ;;  %v1357_v14 = vld [vmem:[%s1854_s4 + $0x184] ss:$8 sps:$4 sm:$0xff]  }
  0x4b   :  { %1212 = vmatpush3.bf16.msra.mxu1 %v1384_v15 }
  0x4c   :  { %1213 = vmatprep.subr.bf16.mxu1 %v1385_v16 }
  0x4f   :  { %1214 = vmatpush3.bf16.msra.mxu1 %v1386_v17 }
  0x50   :  { %1215 = vmatprep.subr.bf16.mxu1 %v1387_v18  ;;  %v1360_v18 = vld [vmem:[%s1854_s4 + $0x194] ss:$8 sps:$4 sm:$0xff]  }
  0x53   :  { %1216 = vmatpush3.bf16.msra.mxu1 %v1388_v19  ;;  %v1358_v19 = vld [vmem:[%s1854_s4 + $0x190] ss:$8 sps:$4 sm:$0xff]  }
  0xf5   :  { %v267_v25 = vpop.f32.mrb[0].mxu1 }
  0xf6   :  { %v341_v27 = vmul.f32 %v324_v22, %v267_v25  ;;  %v269_v28 = vpop.f32.mrb[1].mxu1  ;;  %v1364_v25 = vld [vmem:[%s1854_s4 + $0x1b0] ss:$8 sps:$4 sm:$0xff]  }
  0xf7   :  { %v342_v29 = vmul.f32 %v328_v23, %v269_v28  ;;  %v271_v30 = vpop.f32.mrb[2].mxu1  ;;  %v1372_v28 = vld [vmem:[%s1854_s4 + $0x1d4] ss:$8 sps:$4 sm:$0xff]  }
  0xf8   :  { %v371_v31 = vadd.f32 %v354_v24, %v341_v27  ;;  %v345_v32 = vmul.f32 %v324_v22, %v271_v30  ;;  %v273_v33 = vpop.f32.mrb[3].mxu1  ;;  %v1363_v22 = vld [vmem:[%s1854_s4 + $0x1a4] ss:$8 sps:$4 sm:$0xff]   ;;  %v1367_v27 = vld [vmem:[%s1854_s4 + $0x1c0] ss:$8 sps:$4 sm:$0xff]  }
  0xf9   :  { %v346_v34 = vmul.f32 %v328_v23, %v273_v33  ;;  %v372_v35 = vadd.f32 %v358_v26, %v342_v29  ;;  %v1361_v23 = vld [vmem:[%s1854_s4 + $0x1a0] ss:$8 sps:$4 sm:$0xff]   ;;  %v1370_v29 = vld [vmem:[%s1854_s4 + $0x1d0] ss:$8 sps:$4 sm:$0xff]   ;;  %v1375_v30 = vld [vmem:[%s1854_s4 + $0x1e4] ss:$8 sps:$4 sm:$0xff]  }
  0xfa   :  { %v375_v36 = vadd.f32 %v354_v24, %v345_v32  ;;  %v379_v38 = vmax.f32 %v371_v31, 0.0  ;;  %v1366_v24 = vld [vmem:[%s1854_s4 + $0x1b4] ss:$8 sps:$4 sm:$0xff]   ;;  %v1373_v31 = vld [vmem:[%s1854_s4 + $0x1e0] ss:$8 sps:$4 sm:$0xff]  }
  0xfb   :  { %v376_v37 = vadd.f32 %v358_v26, %v346_v34  ;;  %v380_v40 = vmax.f32 %v372_v35, 0.0  ;;  %v1369_v26 = vld [vmem:[%s1854_s4 + $0x1c4] ss:$8 sps:$4 sm:$0xff]   ;;  %v1378_v32 = vld [vmem:[%s1854_s4 + $0x1f4] ss:$8 sps:$4 sm:$0xff]  }
  0xfc   :  { %v383_v39 = vmax.f32 %v375_v36, 0.0  ;;  %v1376_v33 = vld [vmem:[%s1854_s4 + $0x1f0] ss:$8 sps:$4 sm:$0xff]   ;;  %v1389_v34 = vld [vmem:[%s1857_s7 + $0x68] sm:$0xff]  }
  0xfd   :  { %v384_v41 = vmax.f32 %v376_v37, 0.0  ;;  %v1390_v35 = vld [vmem:[%s1857_s7 + $0x28] sm:$0xff]   ;;  %1217 = vmatprep.subr.bf16.mxu1 %v1389_v34  ;;  %v1391_v36 = vld [vmem:[%s1857_s7 + $0x70] sm:$0xff]  }
  0xfe   :  { %v387_v42 = vpack.c.bf16 %v383_v39, %v379_v38  ;;  %1218 = vmatpush3.bf16.msra.mxu1 %v1390_v35  ;;  %v1392_v37 = vld [vmem:[%s1857_s7 + $0x30] sm:$0xff]   ;;  %v1393_v38 = vld [vmem:[%s1857_s7 + $0x78] sm:$0xff]  }
  0xff   :  { %v388_v43 = vpack.c.bf16 %v384_v41, %v380_v40  ;;  %1219 = vmatprep.subr.bf16.mxu1 %v1391_v36  ;;  %v1394_v39 = vld [vmem:[%s1857_s7 + $0x38] sm:$0xff]   ;;  %v861_v40 = vld [vmem:[%s1858_s5] sm:$0x3] }
 0x100   :  { %v877_v41 = vld [vmem:[%s1859_s6] sm:$0x3] }
 0x101   :  { %807 = vmatprep.mubr.bf16.mxu0 %v388_v43  ;;  %v870_v43 = vrot.slane %v861_v40, %v1705_v21 }
 0x102   :  { %808 = vmatmul.mubr.bf16.vlgmr.msra.gmra.mrb[0].mxu0 %v387_v42  ;;  %1220 = vmatpush3.bf16.msra.mxu1 %v1392_v37  ;;  %v866_v42 = vrot.slane %v861_v40, %v1702_v20 }
 0x103   :  { %819 = vmatpush1.bf16.msra.mxu0 %v1331_v44  ;;  %1221 = vmatprep.subr.bf16.mxu1 %v1393_v38  ;;  %v882_v44 = vrot.slane %v877_v41, %v1702_v20 }
 0x104   :  { %820 = vmatprep.subr.bf16.mxu0 %v1336_v45 }
 0x106   :  { %1222 = vmatpush3.bf16.msra.mxu1 %v1394_v39 }
 0x107   :  { %821 = vmatpush1.bf16.msra.mxu0 %v1334_v46  ;;  %v886_v46 = vrot.slane %v877_v41, %v1705_v21 }
 0x108   :  { %822 = vmatprep.subr.bf16.mxu0 %v1339_v47 }
 0x10b   :  { %823 = vmatpush1.bf16.msra.mxu0 %v1337_v48 }
 0x10c   :  { %824 = vmatprep.subr.bf16.mxu0 %v1342_v49 }
 0x10f   :  { %825 = vmatpush1.bf16.msra.mxu0 %v1340_v50 }
 0x110   :  { %826 = vmatprep.subr.bf16.mxu0 %v1345_v51 }
 0x113   :  { %827 = vmatpush1.bf16.msra.mxu0 %v1343_v52 }
 0x114   :  { %828 = vmatprep.subr.bf16.mxu0 %v1348_v54 }
 0x115   :  { %v310_v58 = vpop.f32.mrb[4].mxu1 }
 0x116   :  { %v343_v60 = vmul.f32 %v1666_v8, %v310_v58  ;;  %v312_v61 = vpop.f32.mrb[5].mxu1 }
 0x117   :  { %829 = vmatpush1.bf16.msra.mxu0 %v1346_v55  ;;  %v344_v63 = vmul.f32 %v336_v56, %v312_v61  ;;  %v314_v0 = vpop.f32.mrb[6].mxu1 }
 0x118   :  { %830 = vmatprep.subr.bf16.mxu0 %v1351_v57  ;;  %v373_v2 = vadd.f32 %v1669_v9, %v343_v60  ;;  %v347_v3 = vmul.f32 %v1666_v8, %v314_v0  ;;  %v316_v4 = vpop.f32.mrb[7].mxu1  ;;  %v1190_v0 = vld [vmem:[%s1860_s8] ss:$0 sm:$0xff] }
 0x119   :  { %v374_v5 = vadd.f32 %v366_v59, %v344_v63  ;;  %v348_v6 = vmul.f32 %v336_v56, %v316_v4 }
 0x11a   :  { %v381_v7 = vmax.f32 %v373_v2, 0.0  ;;  %v377_v10 = vadd.f32 %v1669_v9, %v347_v3  ;;  %v1355_v9 = vld [vmem:[%s1854_s4 + $0x180] ss:$8 sps:$4 sm:$0xff]  }
 0x11b   :  { %831 = vmatpush1.bf16.msra.mxu0 %v1349_v62  ;;  %v382_v12 = vmax.f32 %v374_v5, 0.0  ;;  %v378_v13 = vadd.f32 %v366_v59, %v348_v6 }
 0x11c   :  { %832 = vmatprep.subr.bf16.mxu0 %v1354_v1  ;;  %v385_v15 = vmax.f32 %v377_v10, 0.0 }
 0x11d   :  { %v386_v8 = vmax.f32 %v378_v13, 0.0 }
 0x11e   :  { %v389_v16 = vpack.c.bf16 %v385_v15, %v381_v7 }
 0x11f   :  { %833 = vmatpush1.bf16.msra.mxu0 %v1352_v11  ;;  %v390_v17 = vpack.c.bf16 %v386_v8, %v382_v12 }
 0x120   :  { %834 = vmatprep.subr.bf16.mxu0 %v1357_v14 }
 0x121   :  { %850 = vmatprep.mubr.bf16.mxu0 %v390_v17 }
 0x123   :  { %835 = vmatpush1.bf16.msra.mxu0 %v1355_v9 }
 0x124   :  { %836 = vmatprep.subr.bf16.mxu0 %v1360_v18 }
 0x127   :  { %837 = vmatpush1.bf16.msra.mxu0 %v1358_v19 }
 0x128   :  { %838 = vmatprep.subr.bf16.mxu0 %v1363_v22 }
 0x12b   :  { %839 = vmatpush1.bf16.msra.mxu0 %v1361_v23 }
 0x12c   :  { %840 = vmatprep.subr.bf16.mxu0 %v1366_v24 }
 0x12f   :  { %841 = vmatpush1.bf16.msra.mxu0 %v1364_v25 }
 0x130   :  { %842 = vmatprep.subr.bf16.mxu0 %v1369_v26 }
 0x133   :  { %843 = vmatpush1.bf16.msra.mxu0 %v1367_v27 }
 0x134   :  { %844 = vmatprep.subr.bf16.mxu0 %v1372_v28 }
 0x137   :  { %845 = vmatpush1.bf16.msra.mxu0 %v1370_v29 }
 0x138   :  { %846 = vmatprep.subr.bf16.mxu0 %v1375_v30 }
 0x13b   :  { %847 = vmatpush1.bf16.msra.mxu0 %v1373_v31 }
 0x13c   :  { %848 = vmatprep.subr.bf16.mxu0 %v1378_v32 }
 0x13f   :  { %849 = vmatpush1.bf16.msra.mxu0 %v1376_v33 }
 0x142   :  { %851 = vmatmul.mubr.bf16.vlgmr.msra.gmra.mrb[0].mxu0 %v389_v16 }
 0x215   :  { %v852_v45 = vpop.f32.mrb[0].mxu0 }
 0x216   :  { %v873_v47 = vmul.f32 %v866_v42, %v852_v45  ;;  %v854_v48 = vpop.f32.mrb[1].mxu0 }
 0x217   :  { %v874_v49 = vmul.f32 %v870_v43, %v854_v48  ;;  %v856_v50 = vpop.f32.mrb[2].mxu0 }
 0x218   :  { %v889_v51 = vadd.f32 %v882_v44, %v873_v47  ;;  %v875_v52 = vmul.f32 %v866_v42, %v856_v50  ;;  %v858_v53 = vpop.f32.mrb[3].mxu0 }
 0x219   :  { %v890_v54 = vadd.f32 %v886_v46, %v874_v49  ;;  %v876_v55 = vmul.f32 %v870_v43, %v858_v53 }
 0x21a   :  { %v891_v56 = vadd.f32 %v882_v44, %v875_v52  ;;  %v893_v58 = vmax.f32 %v889_v51, 0.0 }
 0x21b   :  { %v892_v57 = vadd.f32 %v886_v46, %v876_v55  ;;  %v894_v60 = vmax.f32 %v890_v54, 0.0 }
 0x21c   :  { %v895_v59 = vmax.f32 %v891_v56, 0.0 }
 0x21d   :  { %v896_v61 = vmax.f32 %v892_v57, 0.0 }
 0x21e   :  { %v897_v62 = vpack.c.bf16 %v895_v59, %v893_v58 }
 0x21f   :  { %v898_v20 = vpack.c.bf16 %v896_v61, %v894_v60 }
 0x221   :  { %1066 = vmatprep.mubr.bf16.mxu1 %v898_v20 }
 0x222   :  { %1067 = vmatmul.mubr.bf16.vlgmr.msra.gmra.mrb[8].mxu1 %v897_v62 }
 0x2f5   :  { %v1223_v21 = vpop.f32.mrb[8].mxu1 }
 0x2f6   :  { %v1224_v63 = vpop.f32.mrb[9].mxu1 }
 0x2f7   :  { %v1225_v1 = vadd.f32 %v1224_v63, %v1223_v21  ;;  %v1226_v2 = vpop.f32.mrb[10].mxu1 }
 0x2f8   :  { %v1227_v3 = vpop.f32.mrb[11].mxu1 }
 0x2f9   :  { %v1228_v4 = vadd.f32 %v1227_v3, %v1226_v2  ;;  %v1069_v5 = vadd.f32 %v1225_v1, %v1190_v0 }
 0x2fb   :  { %v1072_v6 = vadd.f32 %v1228_v4, %v1190_v0  ;;  %v1075_v7 = vmul.f32 %v1069_v5, %v1069_v5 }
 0x2fd   :  { %1077 = vadd.xlane.f32.xlu0 %v1075_v7  ;;  %v1076_v10 = vmul.f32 %v1072_v6, %v1072_v6 }
 0x301   :  { %1079 = vadd.xlane.f32.xlu0 %v1076_v10 }
 0x38a   :  { %v1078_v11 = vpop.xlane.xlu0 %1077 }
 0x38b   :  { %v1081_v12 = vmax.f32 %v1078_v11, 1e-24 }
 0x38d   :  { %1395 = vrsqrt.f32 %v1081_v12 }
 0x38e   :  { %v1080_v13 = vpop.xlane.xlu0 %1079 }
 0x38f   :  { %v1082_v14 = vmax.f32 %v1080_v13, 1e-24 }
 0x391   :  { %1397 = vrsqrt.f32 %v1082_v14 }
 0x397   :  { %v1396_v15 = vpop.eup %1395 }
 0x398   :  { %v1085_v8 = vmul.f32 %v1396_v15, %v1069_v5 }
 0x39a   :  { %1087 = vst [vmem:[%s1861_s9] sm:$0xff] %v1085_v8 }
 0x39b   :  { %v1398_v16 = vpop.eup %1397 }
 0x39c   :  { %v1086_v9 = vmul.f32 %v1398_v16, %v1072_v6 }
 0x39e   :  { %1088 = vst [vmem:[%s1861_s9 + $0x8] sm:$0xff] %v1086_v9 }

</bundles_post_ra>
